<compile_context>
chip_gen: v7x
topology: tpu7x:2x2x1
jax: 0.10.0
libtpu: 0.0.40
codegen_flags: <defaults>
</compile_context>

<pallas_src>
import functools

import jax
import jax.numpy as jnp
from jax import lax
from jax.experimental import pallas as pl
from jax.experimental.pallas import tpu as pltpu


# ----------------------------------------------------------------------------
# Kernel 1: fused embedding lookup + GRU recurrence over the whole sequence.
# ----------------------------------------------------------------------------
def _gru_seq_kernel(tok_ids_ref,                      # SMEM (T,) scalar-prefetch
                    emb_ref, h0_ref, wih_ref, whh_ref, bih_ref, bhh_ref,
                    out_ref,                          # (T, 1, H) resident output
                    h_scratch,                        # (1, H) VMEM carry
                    *, hidden_size):
    H = hidden_size
    step = pl.program_id(0)

    @pl.when(step == 0)
    def _():
        h_scratch[...] = h0_ref[...]

    tok = tok_ids_ref[step]                           # scalar int32 from SMEM
    x = emb_ref[tok]                                  # (1, H) dynamic row gather
    h = h_scratch[...]                                # (1, H) previous hidden

    # Two packed gate matmuls: (1,H) @ (H,3H), gate order [r | z | n] on lanes.
    gi = jnp.dot(x, wih_ref[...], preferred_element_type=jnp.float32) + bih_ref[...]
    gh = jnp.dot(h, whh_ref[...], preferred_element_type=jnp.float32) + bhh_ref[...]

    r = jax.nn.sigmoid(gi[:, :H] + gh[:, :H])
    z = jax.nn.sigmoid(gi[:, H:2 * H] + gh[:, H:2 * H])
    n = jnp.tanh(gi[:, 2 * H:] + r * gh[:, 2 * H:])   # PyTorch GRU: r * (W_hn h + b_hn)
    h_new = (1.0 - z) * n + z * h

    h_scratch[...] = h_new
    out_ref[step] = h_new.astype(out_ref.dtype)


def pack_gru_params(emb_table, w_ih, w_hh, b_ih, b_hh):
    """One-time (model-load) re-layout so the kernel does zero transposes."""
    V, H = emb_table.shape
    return dict(
        emb=emb_table.reshape(V, 1, H).astype(jnp.float32),  # dynamic index on dim 0
        wih=jnp.transpose(w_ih).astype(jnp.float32),          # (H, 3H), cols [r|z|n]
        whh=jnp.transpose(w_hh).astype(jnp.float32),          # (H, 3H)
        bih=b_ih.reshape(1, 3 * H).astype(jnp.float32),
        bhh=b_hh.reshape(1, 3 * H).astype(jnp.float32),
    )


@jax.jit
def attention_encoder_rnn_forward(token_ids, hidden, emb, wih, whh, bih, bhh):
    """Run the module's forward over a sequence of token ids in one kernel.

    token_ids: (T,) int32
    hidden:    (1, 1, H) initial GRU hidden state
    emb:       (V, 1, H) packed embedding table
    wih/whh:   (H, 3H)   packed GRU weights (gate order r, z, n along lanes)
    bih/bhh:   (1, 3H)   packed GRU biases
    Returns (outputs (T, 1, H), final_hidden (1, 1, H)); per step, output[t]
    equals the hidden state after consuming token t (1-layer, 1-step GRU).
    """
    T = token_ids.shape[0]
    V, _, H = emb.shape
    h0 = hidden.reshape(1, H)
    kernel = functools.partial(_gru_seq_kernel, hidden_size=H)

    outs = pl.pallas_call(
        kernel,
        out_shape=jax.ShapeDtypeStruct((T, 1, H), hidden.dtype),
        grid_spec=pltpu.PrefetchScalarGridSpec(
            num_scalar_prefetch=1,
            grid=(T,),
            in_specs=[
                pl.BlockSpec((V, 1, H), lambda i, toks: (0, 0, 0)),   # emb table
                pl.BlockSpec((1, H), lambda i, toks: (0, 0)),         # h0
                pl.BlockSpec((H, 3 * H), lambda i, toks: (0, 0)),     # W_ih packed
                pl.BlockSpec((H, 3 * H), lambda i, toks: (0, 0)),     # W_hh packed
                pl.BlockSpec((1, 3 * H), lambda i, toks: (0, 0)),     # b_ih
                pl.BlockSpec((1, 3 * H), lambda i, toks: (0, 0)),     # b_hh
            ],
            out_specs=pl.BlockSpec((T, 1, H), lambda i, toks: (0, 0, 0)),
            scratch_shapes=[pltpu.VMEM((1, H), jnp.float32)],
        ),
        compiler_params=pltpu.CompilerParams(
            dimension_semantics=("arbitrary",)),          # recurrent axis
    )(token_ids.astype(jnp.int32), emb, h0, wih, whh, bih, bhh)

    final_hidden = outs[T - 1].reshape(1, 1, H)
    return outs, final_hidden


# ----------------------------------------------------------------------------
# Kernel 2: BilinearAttention companion kernel (exact softmax normalization).
# TODO(synk): fuse into a decoder-step kernel once a decoder exists, so the
#   encoder hiddens stay VMEM-resident across decode steps.
# ----------------------------------------------------------------------------
def _bilinear_attn_kernel(e_ref, d_ref, w_ref, b_ref, o_ref):
    e = e_ref[...]            # (S, H)
    d = d_ref[...]            # (T, H)
    w = w_ref[...]            # (H_out, H_in) PyTorch Linear weight layout
    b = b_ref[...]            # (1, H)

    # proj = d @ W^T as a dot_general contraction (no in-kernel transpose).
    proj = lax.dot_general(d, w, (((1,), (1,)), ((), ())),
                           preferred_element_type=jnp.float32) + b      # (T, H)
    # scores_t[t, s] = <proj[t], e[s]>  ->  (T, S)
    scores_t = lax.dot_general(proj, e, (((1,), (1,)), ((), ())),
                               preferred_element_type=jnp.float32)      # (T, S)

    # Softmax over encoder positions (lane axis). Exact divide: EUP slot is
    # nowhere near saturated at these shapes, so approx buys nothing.
    m = jnp.max(scores_t, axis=-1, keepdims=True)
    p = jnp.exp(scores_t - m)
    weights_t = p / jnp.sum(p, axis=-1, keepdims=True)                  # (T, S)

    o_ref[...] = jnp.dot(weights_t, e,
                         preferred_element_type=jnp.float32).astype(o_ref.dtype)


def bilinear_attention(encoder_hiddens, decoder_hidden, attn_weight, attn_bias):
    """encoder_hiddens: (S,1,H), decoder_hidden: (T,1,H). Returns (T,1,H)."""
    e = jnp.squeeze(encoder_hiddens, axis=1)   # (S, H)
    d = jnp.squeeze(decoder_hidden, axis=1)    # (T, H)
    S, H = e.shape
    T = d.shape[0]
    b2d = attn_bias.reshape(1, H)

    out2d = pl.pallas_call(
        _bilinear_attn_kernel,
        out_shape=jax.ShapeDtypeStruct((T, H), e.dtype),
        in_specs=[
            pl.BlockSpec(memory_space=pltpu.MemorySpace.VMEM),  # enc (S, H)
            pl.BlockSpec(memory_space=pltpu.MemorySpace.VMEM),  # dec (T, H)
            pl.BlockSpec(memory_space=pltpu.MemorySpace.VMEM),  # W   (H, H)
            pl.BlockSpec(memory_space=pltpu.MemorySpace.VMEM),  # b   (1, H)
        ],
        out_specs=pl.BlockSpec(memory_space=pltpu.MemorySpace.VMEM),
    )(e, d, attn_weight, b2d)

    return out2d[:, None, :]                   # (T, 1, H)


# ----------------------------------------------------------------------------
# Pure-JAX references.
# ----------------------------------------------------------------------------
def _gru_reference_step(token_id, hidden, emb_table, w_ih, w_hh, b_ih, b_hh):
    H = emb_table.shape[1]
    x = emb_table[token_id].reshape(1, H)
    h = hidden.reshape(1, H)
    gi = x @ w_ih.T + b_ih
    gh = h @ w_hh.T + b_hh
    i_r, i_z, i_n = gi[:, :H], gi[:, H:2 * H], gi[:, 2 * H:]
    h_r, h_z, h_n = gh[:, :H], gh[:, H:2 * H], gh[:, 2 * H:]
    r = jax.nn.sigmoid(i_r + h_r)
    z = jax.nn.sigmoid(i_z + h_z)
    n = jnp.tanh(i_n + r * h_n)
    h_new = (1.0 - z) * n + z * h
    return h_new.reshape(1, 1, H)


def _attn_reference(encoder_hiddens, decoder_hidden, W, b):
    e = jnp.squeeze(encoder_hiddens, axis=1)
    d = jnp.squeeze(decoder_hidden, axis=1)
    proj = d @ W.T + b
    scores = e @ proj.T
    weights = jax.nn.softmax(scores, axis=0)
    return (weights.T @ e)[:, None, :]


if __name__ == "__main__":
    key = jax.random.PRNGKey(0)
    (k_emb, k_wih, k_whh, k_bih, k_bhh,
     k_e, k_d, k_aw, k_ab) = jax.random.split(key, 9)

    V, H = 64, 32          # input_size (vocab), hidden_size
    S, T_attn = 8, 8       # encoder / decoder lengths for the attention check

    # Embedding + GRU parameters (PyTorch-like uniform init).
    emb_table = jax.random.normal(k_emb, (V, H), dtype=jnp.float32)
    bound = 1.0 / (H ** 0.5)
    w_ih = jax.random.uniform(k_wih, (3 * H, H), minval=-bound, maxval=bound,
                              dtype=jnp.float32)
    w_hh = jax.random.uniform(k_whh, (3 * H, H), minval=-bound, maxval=bound,
                              dtype=jnp.float32)
    b_ih = jax.random.uniform(k_bih, (3 * H,), minval=-bound, maxval=bound,
                              dtype=jnp.float32)
    b_hh = jax.random.uniform(k_bhh, (3 * H,), minval=-bound, maxval=bound,
                              dtype=jnp.float32)

    # One-time weight packing ("model load"), outside the jitted step path.
    params = pack_gru_params(emb_table, w_ih, w_hh, b_ih, b_hh)

    # initHidden()
    hidden = jnp.zeros((1, 1, H), dtype=jnp.float32)

    # Whole recurrence in a single pallas_call.
    token_ids = jnp.array([5, 17, 42], dtype=jnp.int32)
    outs_k, h_k = attention_encoder_rnn_forward(
        token_ids, hidden, params["emb"], params["wih"], params["whh"],
        params["bih"], params["bhh"])
    outs_k = jax.block_until_ready(outs_k)
    h_k = jax.block_until_ready(h_k)

    # Pure-JAX step-by-step reference.
    h_ref = hidden
    refs = []
    for t in list(token_ids):
        h_ref = _gru_reference_step(int(t), h_ref, emb_table,
                                    w_ih, w_hh, b_ih, b_hh)
        refs.append(h_ref.reshape(1, H))
    refs = jnp.stack(refs, axis=0)             # (T, 1, H)

    assert outs_k.shape == (token_ids.shape[0], 1, H), outs_k.shape
    assert h_k.shape == (1, 1, H), h_k.shape
    assert jnp.allclose(outs_k, refs, atol=1e-4, rtol=1e-4), \
        "GRU sequence mismatch vs JAX reference"
    assert jnp.allclose(h_k, h_ref, atol=1e-4, rtol=1e-4), \
        "final hidden mismatch vs JAX reference"

    # Bilinear attention kernel (exact softmax normalization).
    encoder_hiddens = jax.random.normal(k_e, (S, 1, H), dtype=jnp.float32)
    decoder_hidden = jax.random.normal(k_d, (T_attn, 1, H), dtype=jnp.float32)
    attn_weight = jax.random.uniform(k_aw, (H, H), minval=-bound, maxval=bound,
                                     dtype=jnp.float32)
    attn_bias = jax.random.uniform(k_ab, (H,), minval=-bound, maxval=bound,
                                   dtype=jnp.float32)

    attn_out = bilinear_attention(encoder_hiddens, decoder_hidden,
                                  attn_weight, attn_bias)
    attn_out = jax.block_until_ready(attn_out)
    attn_ref = _attn_reference(encoder_hiddens, decoder_hidden,
                               attn_weight, attn_bias)
    assert attn_out.shape == (T_attn, 1, H), attn_out.shape
    assert jnp.allclose(attn_out, attn_ref, atol=1e-5, rtol=1e-5), \
        "attention mismatch vs JAX reference"

    print("KERNEL_OK")
</pallas_src>

<mosaic_0001>
module attributes {stable_mosaic.version = 11 : i64} {
  func.func @_gru_seq_kernel(%arg0: i32, %arg1: memref<3xi32, #tpu.memory_space<smem>>, %arg2: memref<64x1x32xf32, #tpu.memory_space<vmem>>, %arg3: memref<1x32xf32, #tpu.memory_space<vmem>>, %arg4: memref<32x96xf32, #tpu.memory_space<vmem>>, %arg5: memref<32x96xf32, #tpu.memory_space<vmem>>, %arg6: memref<1x96xf32, #tpu.memory_space<vmem>>, %arg7: memref<1x96xf32, #tpu.memory_space<vmem>>, %arg8: memref<3x1x32xf32, #tpu.memory_space<vmem>>, %arg9: memref<1x32xf32, #tpu.memory_space<vmem>>) attributes {dimension_semantics = [#tpu.dimension_semantics<arbitrary>], iteration_bounds = array<i64: 3>, scalar_prefetch = 1 : i64, scratch_operands = 1 : i64, tpu.core_type = #tpu.core_type<tc>, window_params = [{pipeline_mode = #tpu.pipeline_mode<synchronous>, transform_indices = @transform_0, window_bounds = array<i64: 64, 1, 32>}, {pipeline_mode = #tpu.pipeline_mode<synchronous>, transform_indices = @transform_1, window_bounds = array<i64: 1, 32>}, {pipeline_mode = #tpu.pipeline_mode<synchronous>, transform_indices = @transform_2, window_bounds = array<i64: 32, 96>}, {pipeline_mode = #tpu.pipeline_mode<synchronous>, transform_indices = @transform_3, window_bounds = array<i64: 32, 96>}, {pipeline_mode = #tpu.pipeline_mode<synchronous>, transform_indices = @transform_4, window_bounds = array<i64: 1, 96>}, {pipeline_mode = #tpu.pipeline_mode<synchronous>, transform_indices = @transform_5, window_bounds = array<i64: 1, 96>}, {pipeline_mode = #tpu.pipeline_mode<synchronous>, transform_indices = @transform_6, window_bounds = array<i64: 3, 1, 32>}]} {
    %c0_i32 = arith.constant 0 : i32
    %0 = arith.cmpi eq, %arg0, %c0_i32 : i32
    %1 = arith.extui %0 : i1 to i32
    %c0_i32_0 = arith.constant 0 : i32
    %2 = arith.cmpi ne, %1, %c0_i32_0 : i32
    scf.if %2 {
      %c0_20 = arith.constant 0 : index
      %c0_21 = arith.constant 0 : index
      %48 = vector.load %arg3[%c0_20, %c0_21] : memref<1x32xf32, #tpu.memory_space<vmem>>, vector<1x32xf32>
      %c0_22 = arith.constant 0 : index
      %c0_23 = arith.constant 0 : index
      %49 = vector.load %arg9[%c0_22, %c0_23] : memref<1x32xf32, #tpu.memory_space<vmem>>, vector<1x32xf32>
      tpu.vector_store %arg9[%c0_22, %c0_23], %48 {strides = array<i32>} : memref<1x32xf32, #tpu.memory_space<vmem>>, vector<1x32xf32>,
    } else {
    }
    %3 = arith.index_cast %arg0 : i32 to index
    %4 = memref.load %arg1[%3] : memref<3xi32, #tpu.memory_space<smem>>
    %5 = arith.index_cast %4 : i32 to index
    %c0 = arith.constant 0 : index
    %c0_1 = arith.constant 0 : index
    %6 = vector.load %arg2[%5, %c0, %c0_1] : memref<64x1x32xf32, #tpu.memory_space<vmem>>, vector<1x1x32xf32>
    %7 = vector.shape_cast %6 : vector<1x1x32xf32> to vector<1x32xf32>
    %c0_2 = arith.constant 0 : index
    %c0_3 = arith.constant 0 : index
    %8 = vector.load %arg9[%c0_2, %c0_3] : memref<1x32xf32, #tpu.memory_space<vmem>>, vector<1x32xf32>
    %c0_4 = arith.constant 0 : index
    %c0_5 = arith.constant 0 : index
    %9 = vector.load %arg4[%c0_4, %c0_5] : memref<32x96xf32, #tpu.memory_space<vmem>>, vector<32x96xf32>
    %cst = arith.constant dense<0.000000e+00> : vector<1x96xf32>
    %10 = tpu.matmul %7, %9, %cst {dimension_numbers = #tpu.dot_dimension_numbers<[1], [0], [0], [1], [0, 0, 1, 1], [], []>} : vector<1x32xf32>, vector<32x96xf32>, vector<1x96xf32> -> vector<1x96xf32>
    %c0_6 = arith.constant 0 : index
    %c0_7 = arith.constant 0 : index
    %11 = vector.load %arg6[%c0_6, %c0_7] : memref<1x96xf32, #tpu.memory_space<vmem>>, vector<1x96xf32>
    %12 = arith.addf %10, %11 : vector<1x96xf32>
    %c0_8 = arith.constant 0 : index
    %c0_9 = arith.constant 0 : index
    %13 = vector.load %arg5[%c0_8, %c0_9] : memref<32x96xf32, #tpu.memory_space<vmem>>, vector<32x96xf32>
    %cst_10 = arith.constant dense<0.000000e+00> : vector<1x96xf32>
    %14 = tpu.matmul %8, %13, %cst_10 {dimension_numbers = #tpu.dot_dimension_numbers<[1], [0], [0], [1], [0, 0, 1, 1], [], []>} : vector<1x32xf32>, vector<32x96xf32>, vector<1x96xf32> -> vector<1x96xf32>
    %c0_11 = arith.constant 0 : index
    %c0_12 = arith.constant 0 : index
    %15 = vector.load %arg7[%c0_11, %c0_12] : memref<1x96xf32, #tpu.memory_space<vmem>>, vector<1x96xf32>
    %16 = arith.addf %14, %15 : vector<1x96xf32>
    %17 = vector.extract_strided_slice %12 {offsets = [0, 0], sizes = [1, 32], strides = [1, 1]} : vector<1x96xf32> to vector<1x32xf32>
    %18 = vector.extract_strided_slice %16 {offsets = [0, 0], sizes = [1, 32], strides = [1, 1]} : vector<1x96xf32> to vector<1x32xf32>
    %19 = arith.addf %17, %18 : vector<1x32xf32>
    %20 = arith.negf %19 : vector<1x32xf32>
    %21 = math.exp %20 : vector<1x32xf32>
    %cst_13 = arith.constant 1.000000e+00 : f32
    %22 = vector.broadcast %cst_13 : f32 to vector<1x32xf32>
    %23 = arith.addf %22, %21 : vector<1x32xf32>
    %24 = arith.divf %22, %23 : vector<1x32xf32>
    %25 = vector.extract_strided_slice %12 {offsets = [0, 32], sizes = [1, 32], strides = [1, 1]} : vector<1x96xf32> to vector<1x32xf32>
    %26 = vector.extract_strided_slice %16 {offsets = [0, 32], sizes = [1, 32], strides = [1, 1]} : vector<1x96xf32> to vector<1x32xf32>
    %27 = arith.addf %25, %26 : vector<1x32xf32>
    %28 = arith.negf %27 : vector<1x32xf32>
    %29 = math.exp %28 : vector<1x32xf32>
    %cst_14 = arith.constant 1.000000e+00 : f32
    %30 = vector.broadcast %cst_14 : f32 to vector<1x32xf32>
    %31 = arith.addf %30, %29 : vector<1x32xf32>
    %32 = arith.divf %30, %31 : vector<1x32xf32>
    %33 = vector.extract_strided_slice %12 {offsets = [0, 64], sizes = [1, 32], strides = [1, 1]} : vector<1x96xf32> to vector<1x32xf32>
    %34 = vector.extract_strided_slice %16 {offsets = [0, 64], sizes = [1, 32], strides = [1, 1]} : vector<1x96xf32> to vector<1x32xf32>
    %35 = arith.mulf %24, %34 : vector<1x32xf32>
    %36 = arith.addf %33, %35 : vector<1x32xf32>
    %37 = math.tanh %36 : vector<1x32xf32>
    %cst_15 = arith.constant 1.000000e+00 : f32
    %38 = vector.broadcast %cst_15 : f32 to vector<1x32xf32>
    %39 = arith.subf %38, %32 : vector<1x32xf32>
    %40 = arith.mulf %39, %37 : vector<1x32xf32>
    %41 = arith.mulf %32, %8 : vector<1x32xf32>
    %42 = arith.addf %40, %41 : vector<1x32xf32>
    %c0_16 = arith.constant 0 : index
    %c0_17 = arith.constant 0 : index
    %43 = vector.load %arg9[%c0_16, %c0_17] : memref<1x32xf32, #tpu.memory_space<vmem>>, vector<1x32xf32>
    tpu.vector_store %arg9[%c0_16, %c0_17], %42 {strides = array<i32>} : memref<1x32xf32, #tpu.memory_space<vmem>>, vector<1x32xf32>,
    %44 = arith.index_cast %arg0 : i32 to index
    %c0_18 = arith.constant 0 : index
    %c0_19 = arith.constant 0 : index
    %45 = vector.load %arg8[%44, %c0_18, %c0_19] : memref<3x1x32xf32, #tpu.memory_space<vmem>>, vector<1x1x32xf32>
    %46 = vector.shape_cast %45 : vector<1x1x32xf32> to vector<1x32xf32>
    %47 = vector.shape_cast %42 : vector<1x32xf32> to vector<1x1x32xf32>
    tpu.vector_store %arg8[%44, %c0_18, %c0_19], %47 {strides = array<i32>} : memref<3x1x32xf32, #tpu.memory_space<vmem>>, vector<1x1x32xf32>,
    return
  }
  func.func @transform_0(%arg0: i32, %arg1: memref<3xi32, #tpu.memory_space<smem>>) -> (i32, i32, i32) {
    %c0_i32 = arith.constant 0 : i32
    %c0_i32_0 = arith.constant 0 : i32
    %c0_i32_1 = arith.constant 0 : i32
    %c0_i32_2 = arith.constant 0 : i32
    return %c0_i32, %c0_i32_0, %c0_i32_1 : i32, i32, i32
  }
  func.func @transform_1(%arg0: i32, %arg1: memref<3xi32, #tpu.memory_space<smem>>) -> (i32, i32) {
    %c0_i32 = arith.constant 0 : i32
    %c0_i32_0 = arith.constant 0 : i32
    %c0_i32_1 = arith.constant 0 : i32
    return %c0_i32, %c0_i32_0 : i32, i32
  }
  func.func @transform_2(%arg0: i32, %arg1: memref<3xi32, #tpu.memory_space<smem>>) -> (i32, i32) {
    %c0_i32 = arith.constant 0 : i32
    %c0_i32_0 = arith.constant 0 : i32
    %c0_i32_1 = arith.constant 0 : i32
    return %c0_i32, %c0_i32_0 : i32, i32
  }
  func.func @transform_3(%arg0: i32, %arg1: memref<3xi32, #tpu.memory_space<smem>>) -> (i32, i32) {
    %c0_i32 = arith.constant 0 : i32
    %c0_i32_0 = arith.constant 0 : i32
    %c0_i32_1 = arith.constant 0 : i32
    return %c0_i32, %c0_i32_0 : i32, i32
  }
  func.func @transform_4(%arg0: i32, %arg1: memref<3xi32, #tpu.memory_space<smem>>) -> (i32, i32) {
    %c0_i32 = arith.constant 0 : i32
    %c0_i32_0 = arith.constant 0 : i32
    %c0_i32_1 = arith.constant 0 : i32
    return %c0_i32, %c0_i32_0 : i32, i32
  }
  func.func @transform_5(%arg0: i32, %arg1: memref<3xi32, #tpu.memory_space<smem>>) -> (i32, i32) {
    %c0_i32 = arith.constant 0 : i32
    %c0_i32_0 = arith.constant 0 : i32
    %c0_i32_1 = arith.constant 0 : i32
    return %c0_i32, %c0_i32_0 : i32, i32
  }
  func.func @transform_6(%arg0: i32, %arg1: memref<3xi32, #tpu.memory_space<smem>>) -> (i32, i32, i32) {
    %c0_i32 = arith.constant 0 : i32
    %c0_i32_0 = arith.constant 0 : i32
    %c0_i32_1 = arith.constant 0 : i32
    %c0_i32_2 = arith.constant 0 : i32
    return %c0_i32, %c0_i32_0, %c0_i32_1 : i32, i32, i32
  }
}

</mosaic_0001>

<bundles_post_ra>
// kernel: attention_encoder_rnn_forward.1
= control target key start
LH: loop header
LB: loop body
LE: loop exit
PB: predicated region body
PF: predicated region fallthrough
CT: control target
= control target key end

     0   :  { %s652_s0 = inlined_call_operand.vmem [shape: s32[3], index: 0, kind: input, shape index: {}]   ;;  %s653_s1 = inlined_call_operand.vmem [shape: f32[64,1,32], index: 1, kind: input, shape index: {}]   ;;  %s654_s2 = inlined_call_operand.vmem [shape: f32[1,32], index: 2, kind: input, shape index: {}]   ;;  %s655_s3 = inlined_call_operand.vmem [shape: f32[32,96], index: 3, kind: input, shape index: {}]   ;;  %s656_s4 = inlined_call_operand.vmem [shape: f32[32,96], index: 4, kind: input, shape index: {}]   ;;  %s657_s5 = inlined_call_operand.vmem [shape: f32[1,96], index: 5, kind: input, shape index: {}]   ;;  %s658_s6 = inlined_call_operand.vmem [shape: f32[1,96], index: 6, kind: input, shape index: {}]   ;;  %s659_s7 = inlined_call_operand.vmem [shape: f32[3,1,32], index: 7, kind: output, shape index: {}]  }
   0x1   :  { %s12_s26 = sshll.u32 %s652_s0, 4  ;;  %s13_s26 = int_to_ptr.vmem [resolvable:$true] %s12_s26 }
   0x2   :  { %s525_s27 = scalar_lea.vmem %s13_s26, 16  ;;  %p530_p1 = scmp.lt.s32.totalorder %s13_s26, %s13_s26 }
   0x3   :  { %p526_p0 = scmp.ne.s32.totalorder %s13_s26, %s525_s27  ;;  %p531_p2 = scmp.lt.s32.totalorder %s525_s27, %s525_s27 }
   0x5   :  { %p532_p3 = por %p531_p2, %p530_p1 }
   0x7   :  { %p533_p4 = pnand %p532_p3, %p526_p0 }
   0x9   :  { %536 = shalt.err (!%p533_p4)  }
   0xa   :  { %s547_s28 = smov [#allocation4]  }
   0xb   :  { %15 = dma.vmem_to_smem %s13_s26, 16, %s547_s28, [#allocation3] }
   0xc   :  { %541 = dma.done.wait [#allocation3], 16 }
   0xd   :  { %542 = vsyncadd [#allocation3], 4294967280 }
   0xe   :  { %17 = sfence }
   0xf   :  { %s597_s29 = smov 0  }
  0x10 LB: > { %s603_s0 = sadd.s32 4294967295, %s545_s29   ;;  %p453_p5 = scmp.ge.s32.totalorder %s545_s29, 1  ;;  %s545_s29 = sphi %s597_s29, %s23_s29  }
  0x11   : > { %p204_p6 = scmp.lt.s32.totalorder %s545_s29, 4 }
  0x13   : > { %p205_p7 = pnand %p453_p5, %p204_p6 }
  0x14   : > { %p454_p8 = scmp.ne.s32.totalorder (!%p205_p7), %s603_s0, 0 }
  0x15   : > { %208 = sbr.rel (%p205_p7) target bundleno = 744 (0x2e8), region = 44 }
  0x1c   : > { %227 = sbr.rel (%p454_p8) target bundleno = 35 (0x23), region = 48  ;;  %v228_v0 = vld [vmem:[%s654_s2] sm:$0x1] (!%p454_p8)  ;;  %vm229_vm0 = vcmask (!%p454_p8), 253952  }
  0x1d   : > { %230 = vst.msk [vmem:[#allocation2] sm:$0x1] (!%p454_p8), %vm229_vm0, %v228_v0 }
  0x23 PF: > { %v235_v1 = vld [vmem:[%s655_s3] sm:$0xff]  ;;  %v236_v2 = vld [vmem:[%s655_s3 + $0x8] sm:$0xff]  ;;  %v548_v4 = vmov 0.0|0.0   ;;  %v237_v7 = vld [vmem:[%s655_s3 + $0x10] sm:$0xff]  ;;  %s231_s21 = sld [smem:[#allocation4 + %s603_s0]]  ;;  %vm549_vm1 = vmmov 0   ;;  %v416_v34 = vlaneseq  ;;  %s431_s16 = scalar_lea.vmem %s659_s7, %s603_s0 }
  0x24   : > { %v314_v3 = vld [vmem:[%s656_s4] sm:$0xff]  ;;  %492 = vmatprep.subr.bf16.mxu0 %v548_v4  ;;  %498 = vmatprep.subr.bf16.mxu1 %v548_v4  ;;  %v493_v5 = vpack.c.bf16 %v236_v2, %v235_v1  ;;  %v315_v6 = vld [vmem:[%s656_s4 + $0x8] sm:$0xff]  ;;  %v238_v8 = vld [vmem:[%s655_s3 + $0x18] sm:$0xff]  ;;  %v550_v12 = vmov 0.0   ;;  %vm240_vm2 = vcmask 261120   ;;  %s551_s9 = smov 64  }
  0x25   : > { %v499_v9 = vpack.c.bf16 %v315_v6, %v314_v3  ;;  %v316_v10 = vld [vmem:[%s656_s4 + $0x10] sm:$0xff]  ;;  %v317_v11 = vld [vmem:[%s656_s4 + $0x18] sm:$0xff]  ;;  %478 = vmatprep.mubr.msk.f32.mxu0 %vm549_vm1, %v550_v12  ;;  %489 = vmatprep.mubr.msk.f32.mxu1 %vm549_vm1, %v550_v12  ;;  %v496_v13 = vpack.c.bf16 %v238_v8, %v237_v7  ;;  %v234_v16 = vld [vmem:[#allocation2] sm:$0x1]  ;;  %v417_v35 = vshrl.u32 %v416_v34, 7  ;;  %s552_s12 = smov 96  }
  0x26   : > { %494 = vmatpush3.bf16.msra.mxu0 %v493_v5  ;;  %v502_v14 = vpack.c.bf16 %v317_v11, %v316_v10  ;;  %v318_v17 = vld [vmem:[%s658_s6] sm:$0x1]  ;;  %s553_s13 = smov 32   ;;  %vm429_vm3 = vcmask 253952  }
  0x27   : > { %500 = vmatpush3.bf16.msra.mxu1 %v499_v9  ;;  %495 = vmatprep.subr.bf16.mxu0 %v548_v4  ;;  %v239_v23 = vld [vmem:[%s657_s5] sm:$0x1]  ;;  %v418_v36 = vsub.s32 0, %v417_v35 }
  0x28   : > { %501 = vmatprep.subr.bf16.mxu1 %v548_v4 }
  0x29   : > { %s232_s28 = scalar_lea.vmem %s653_s1, %s231_s21  ;;  %v419_v38 = vrot.slane %v234_v16, %v418_v36 }
  0x2a   : > { %497 = vmatpush3.bf16.msra.mxu0 %v496_v13  ;;  %v233_v15 = vld [vmem:[%s232_s28] sm:$0x1] }
  0x2b   : > { %503 = vmatpush3.bf16.msra.mxu1 %v502_v14 }
  0x2d   : > { %479 = vmatmul.mubr.msk.f32.vlgmr.msra.gmra.mrb[0].mxu0 %vm240_vm2, %v233_v15 }
  0x2e   : > { %490 = vmatmul.mubr.msk.f32.vlgmr.msra.gmra.mrb[0].mxu1 %vm240_vm2, %v234_v16 }
 0x100   : > { %v310_v18 = vpop.f32.mrb[0].mxu0 }
 0x101   : > { %v388_v19 = vpop.f32.mrb[0].mxu1  ;;  %v480_v20 = vpop.f32.mrb[1].mxu0  ;;  %v311_v24 = vadd.f32 %v310_v18, %v239_v23 }
 0x102   : > { %v389_v21 = vadd.f32 %v388_v19, %v318_v17  ;;  %v491_v22 = vpop.f32.mrb[1].mxu1 }
 0x104   : > { %400 = vrot.lane.b32.xlu0 %v389_v21, %s551_s9  ;;  %v392_v25 = vadd.f32 %v389_v21, %v311_v24 }
 0x106   : > { %v457_v26 = vmul.f32 -1.442695, %v392_v25 }
 0x108   : > { %519 = vpow2.f32 %v457_v26 }
 0x112   : > { %v520_v27 = vpop.eup %519 }
 0x113   : > { %v396_v28 = vadd.f32 1.0, %v520_v27 }
 0x115   : > { %521 = vrcp.f32 %v396_v28 }
 0x11f   : > { %v522_v29 = vpop.eup %521 }
 0x120   : > { %v410_v40 = vsub.f32 1.0, %v522_v29 }
 0x176   : > { %v401_v30 = vpop.permute.xlu0 %400 }
 0x177   : > { %v403_v31 = vmul.f32 %v522_v29, %v401_v30 }
 0x179   : > { %405 = vrot.lane.b32.xlu0 %v403_v31, %s551_s9 }
 0x1eb   : > { %v406_v32 = vpop.permute.xlu0 %405 }
 0x1ec   : > { %v408_v33 = vadd.f32 %v406_v32, %v311_v24 }
 0x1ee   : > { %523 = vtanh.f32 %v408_v33 }
 0x1f8   : > { %v524_v37 = vpop.eup %523 }
 0x1f9   : > { %412 = vrot.lane.b32.xlu1 %v524_v37, %s552_s12 }
 0x1fd   : > { %420 = vrot.lane.b32.xlu1 %v419_v38, %s553_s13 }
 0x26b   : > { %v413_v39 = vpop.permute.xlu1 %412 }
 0x26c   : > { %v415_v42 = vmul.f32 %v413_v39, %v410_v40 }
 0x26f   : > { %v421_v41 = vpop.permute.xlu1 %420 }
 0x270   : > { %v423_v43 = vmul.f32 %v522_v29, %v421_v41 }
 0x272   : > { %v424_v44 = vadd.f32 %v423_v43, %v415_v42 }
 0x274   : > { %426 = vrot.lane.b32.xlu0 %v424_v44, %s552_s12 }
 0x2e6   : > { %v427_v45 = vpop.permute.xlu0 %426 }
 0x2e7   : > { %430 = vst.msk [vmem:[#allocation2] sm:$0x1] %vm429_vm3, %v427_v45  ;;  %432 = vst.msk [vmem:[%s431_s16] sm:$0x1] %vm429_vm3, %v427_v45 }
 0x2e8 PF: > { %s23_s29 = sadd.s32 1, %s545_s29  }
 0x2e9   : > { %p20_p9 = scmp.ge.s32.totalorder %s23_s29, 5  }
 0x2eb   :  { %22 = sbr.rel (!%p20_p9) target bundleno = 16 (0x10), region = 73 }

</bundles_post_ra>
